<compile_context>
chip_gen: v7x
topology: tpu7x:2x2x1
jax: 0.10.0
libtpu: 0.0.40
codegen_flags: <defaults>
</compile_context>

<pallas_src>
import jax
import jax.numpy as jnp
from jax.experimental import pallas as pl
from jax.experimental.pallas import tpu as pltpu


def _round_up(x, m):
    return ((x + m - 1) // m) * m


def adapter_kernel(x_ref, wd_ref, bd_ref, wu_ref, bu_ref, o_ref):
    # x_ref:  [TM, D] activation dtype (f32 or bf16)  -- also the residual source
    # wd_ref: [D, A]  bf16   down_project weight (pre-transposed vs torch's [A, D])
    # bd_ref: [1, A]  f32    down_project bias
    # wu_ref: [A, D]  bf16   up_project weight   (pre-transposed vs torch's [D, A])
    # bu_ref: [1, D]  f32    up_project bias
    # o_ref:  [TM, D] same dtype as x
    x_bf = x_ref[...].astype(jnp.bfloat16)            # bf16 operands feed the MXU

    # down_project + bias + ReLU (f32 accumulation, f32 bias math)
    h = jnp.dot(x_bf, wd_ref[...], preferred_element_type=jnp.float32)
    h = jnp.maximum(h + bd_ref[...], 0.0)

    # up_project + bias + residual; residual re-read from x_ref (cheap vld, no
    # long-lived f32 copy across both matmuls)
    y = jnp.dot(h.astype(jnp.bfloat16), wu_ref[...],
                preferred_element_type=jnp.float32)
    o_ref[...] = (y + bu_ref[...] + x_ref[...].astype(jnp.float32)).astype(o_ref.dtype)


def _vmem_budget_and_limit():
    """Generation-aware (tile-chooser budget, vmem_limit_bytes)."""
    try:
        cap = pltpu.get_tpu_info().vmem_capacity_bytes
    except Exception:
        cap = 64 * 1024 * 1024           # unknown chip: assume v7x-sized VMEM (safe everywhere)
    if cap >= 100 * 1024 * 1024:         # v5e / v6e: 128 MiB per TensorCore
        return 96 * 1024 * 1024, 100 * 1024 * 1024
    return 40 * 1024 * 1024, 52 * 1024 * 1024   # v7x: 64 MiB per TensorCore


def _choose_row_tile(n_rows, d, a, x_bytes, out_bytes, budget):
    """Largest power-of-two row tile (multiple of 8) whose VMEM footprint fits."""
    # Resident weights (bf16) + biases (f32); counted double-buffered so the
    # estimate stays safe even if the single-buffer request is unavailable.
    resident = 2 * (2 * d * a * 2) + 2 * 4 * (a + d)

    def footprint(tm):
        io = 2 * tm * d * (x_bytes + out_bytes)            # double-buffered x-in + out tiles
        tmp = tm * d * 2 + tm * a * (4 + 2) + tm * d * 4   # x_bf, h (f32 + bf16), y (f32)
        return io + tmp + resident

    tm = 1024
    while tm > 8 and footprint(tm) > budget:
        tm //= 2
    # Keep the row grid at >= 2 steps so the "parallel" axis spans both v7x TensorCores.
    tm = min(tm, max(8, _round_up(pl.cdiv(n_rows, 2), 8)))
    return max(8, tm)


def adapter_layer(x, w_down, b_down, w_up, b_up, *, single_buffer_weights=True):
    """AdapterLayer forward: relu(x @ w_down + b_down) @ w_up + b_up + x.

    x:      [B, S, D] (f32 or bf16)
    w_down: [D, A]  (pre-transposed vs torch's [A, D] weight)
    b_down: [A]
    w_up:   [A, D]  (pre-transposed vs torch's [D, A] weight)
    b_up:   [D]
    """
    B, S, D = x.shape
    A = w_down.shape[1]
    N = B * S
    x_bytes = jnp.dtype(x.dtype).itemsize
    out_bytes = x_bytes

    budget, vmem_limit = _vmem_budget_and_limit()
    TM = _choose_row_tile(N, D, A, x_bytes, out_bytes, budget)
    grid = (pl.cdiv(N, TM),)

    # No activation pad / cast: reshape is free; a partial final row block is masked.
    x2d = x.reshape(N, D)
    wd = w_down.astype(jnp.bfloat16)
    wu = w_up.astype(jnp.bfloat16)
    bd = b_down.reshape(1, A).astype(jnp.float32)
    bu = b_up.reshape(1, D).astype(jnp.float32)

    def resident_spec(shape):
        idx = lambda i: (0,) * len(shape)
        if single_buffer_weights:
            # Constant index_map -> no steady-state re-DMA; 2nd buffer is dead VMEM.
            return pl.BlockSpec(shape, idx, pipeline_mode=pl.Buffered(1))
        return pl.BlockSpec(shape, idx)

    cost = pl.CostEstimate(
        flops=4 * N * D * A,                           # two matmuls, 2 flops/MAC each
        transcendentals=0,
        bytes_accessed=N * D * (x_bytes + out_bytes)   # activations in + out (native dtype)
        + 2 * D * A * 2                                # resident bf16 weights
        + (A + D) * 4,                                 # resident f32 biases
    )

    out2d = pl.pallas_call(
        adapter_kernel,
        out_shape=jax.ShapeDtypeStruct((N, D), x.dtype),
        grid_spec=pltpu.PrefetchScalarGridSpec(
            num_scalar_prefetch=0,
            grid=grid,
            in_specs=[
                pl.BlockSpec((TM, D), lambda i: (i, 0)),  # x tile: marches over rows
                resident_spec((D, A)),                     # w_down: VMEM-resident
                resident_spec((1, A)),                     # b_down: VMEM-resident
                resident_spec((A, D)),                     # w_up:   VMEM-resident
                resident_spec((1, D)),                     # b_up:   VMEM-resident
            ],
            out_specs=pl.BlockSpec((TM, D), lambda i: (i, 0)),
        ),
        compiler_params=pltpu.CompilerParams(
            dimension_semantics=("parallel",),             # rows independent -> both TCs on v7x
            vmem_limit_bytes=vmem_limit,
        ),
        cost_estimate=cost,
    )(x2d, wd, bd, wu, bu)

    return out2d.reshape(B, S, D)


def _torch_style_linear_init(key, fan_in, fan_out):
    """Deterministic init mimicking nn.Linear: U(-1/sqrt(fan_in), 1/sqrt(fan_in)).
    Returns weight transposed to [fan_in, fan_out] plus bias [fan_out]."""
    k_w, k_b = jax.random.split(key)
    bound = 1.0 / jnp.sqrt(jnp.float32(fan_in))
    w = jax.random.uniform(k_w, (fan_in, fan_out), jnp.float32, -bound, bound)
    b = jax.random.uniform(k_b, (fan_out,), jnp.float32, -bound, bound)
    return w, b


if __name__ == "__main__":
    batch, seq, input_dim, adapter_dim = 2, 8, 32, 16

    key = jax.random.PRNGKey(0)
    k_x, k_down, k_up = jax.random.split(key, 3)

    x = jax.random.normal(k_x, (batch, seq, input_dim), jnp.float32)
    w_down, b_down = _torch_style_linear_init(k_down, input_dim, adapter_dim)
    w_up, b_up = _torch_style_linear_init(k_up, adapter_dim, input_dim)

    try:
        out = jax.block_until_ready(
            jax.jit(adapter_layer)(x, w_down, b_down, w_up, b_up))
    except Exception:
        # Fallback if this JAX build rejects single-buffered (pl.Buffered(1))
        # resident operands: identical kernel with default double-buffered weights.
        fwd = jax.jit(lambda *a: adapter_layer(*a, single_buffer_weights=False))
        out = jax.block_until_ready(fwd(x, w_down, b_down, w_up, b_up))

    # Pure-JAX f32 reference of the same forward.  The kernel runs the matmuls with
    # bf16 operands / f32 accumulation (bias + residual stay f32), so compare with a
    # bf16-appropriate tolerance.
    h_ref = jnp.maximum(x @ w_down + b_down, 0.0)
    ref = h_ref @ w_up + b_up + x
    assert out.shape == (batch, seq, input_dim)
    err = float(jnp.max(jnp.abs(out - ref)))
    assert jnp.allclose(out, ref, atol=3e-2, rtol=3e-2), f"max abs err {err}"

    print("KERNEL_OK")
</pallas_src>

<mosaic_0001>
module attributes {stable_mosaic.version = 11 : i64} {
  func.func @adapter_kernel(%arg0: i32, %arg1: memref<8x32xf32, #tpu.memory_space<vmem>>, %arg2: memref<32x16xbf16, #tpu.memory_space<vmem>>, %arg3: memref<1x16xf32, #tpu.memory_space<vmem>>, %arg4: memref<16x32xbf16, #tpu.memory_space<vmem>>, %arg5: memref<1x32xf32, #tpu.memory_space<vmem>>, %arg6: memref<8x32xf32, #tpu.memory_space<vmem>>) attributes {dimension_semantics = [#tpu.dimension_semantics<parallel>], iteration_bounds = array<i64: 2>, scalar_prefetch = 0 : i64, scratch_operands = 0 : i64, tpu.core_type = #tpu.core_type<tc>, window_params = [{transform_indices = @transform_0, window_bounds = array<i64: 8, 32>}, {pipeline_mode = #tpu.pipeline_mode<synchronous>, transform_indices = @transform_1, window_bounds = array<i64: 32, 16>}, {pipeline_mode = #tpu.pipeline_mode<synchronous>, transform_indices = @transform_2, window_bounds = array<i64: 1, 16>}, {pipeline_mode = #tpu.pipeline_mode<synchronous>, transform_indices = @transform_3, window_bounds = array<i64: 16, 32>}, {pipeline_mode = #tpu.pipeline_mode<synchronous>, transform_indices = @transform_4, window_bounds = array<i64: 1, 32>}, {transform_indices = @transform_5, window_bounds = array<i64: 8, 32>}]} {
    %c0 = arith.constant 0 : index
    %c0_0 = arith.constant 0 : index
    %0 = vector.load %arg1[%c0, %c0_0] : memref<8x32xf32, #tpu.memory_space<vmem>>, vector<8x32xf32>
    %1 = arith.truncf %0 : vector<8x32xf32> to vector<8x32xbf16>
    %c0_1 = arith.constant 0 : index
    %c0_2 = arith.constant 0 : index
    %2 = vector.load %arg2[%c0_1, %c0_2] : memref<32x16xbf16, #tpu.memory_space<vmem>>, vector<32x16xbf16>
    %cst = arith.constant dense<0.000000e+00> : vector<8x16xf32>
    %3 = tpu.matmul %1, %2, %cst {dimension_numbers = #tpu.dot_dimension_numbers<[1], [0], [0], [1], [0, 0, 1, 1], [], []>} : vector<8x32xbf16>, vector<32x16xbf16>, vector<8x16xf32> -> vector<8x16xf32>
    %c0_3 = arith.constant 0 : index
    %c0_4 = arith.constant 0 : index
    %4 = vector.load %arg3[%c0_3, %c0_4] : memref<1x16xf32, #tpu.memory_space<vmem>>, vector<1x16xf32>
    %5 = vector.broadcast %4 : vector<1x16xf32> to vector<8x16xf32>
    %6 = arith.addf %3, %5 : vector<8x16xf32>
    %cst_5 = arith.constant 0.000000e+00 : f32
    %7 = vector.broadcast %cst_5 : f32 to vector<8x16xf32>
    %8 = arith.maximumf %6, %7 : vector<8x16xf32>
    %9 = arith.truncf %8 : vector<8x16xf32> to vector<8x16xbf16>
    %c0_6 = arith.constant 0 : index
    %c0_7 = arith.constant 0 : index
    %10 = vector.load %arg4[%c0_6, %c0_7] : memref<16x32xbf16, #tpu.memory_space<vmem>>, vector<16x32xbf16>
    %cst_8 = arith.constant dense<0.000000e+00> : vector<8x32xf32>
    %11 = tpu.matmul %9, %10, %cst_8 {dimension_numbers = #tpu.dot_dimension_numbers<[1], [0], [0], [1], [0, 0, 1, 1], [], []>} : vector<8x16xbf16>, vector<16x32xbf16>, vector<8x32xf32> -> vector<8x32xf32>
    %c0_9 = arith.constant 0 : index
    %c0_10 = arith.constant 0 : index
    %12 = vector.load %arg5[%c0_9, %c0_10] : memref<1x32xf32, #tpu.memory_space<vmem>>, vector<1x32xf32>
    %13 = vector.broadcast %12 : vector<1x32xf32> to vector<8x32xf32>
    %14 = arith.addf %11, %13 : vector<8x32xf32>
    %c0_11 = arith.constant 0 : index
    %c0_12 = arith.constant 0 : index
    %15 = vector.load %arg1[%c0_11, %c0_12] : memref<8x32xf32, #tpu.memory_space<vmem>>, vector<8x32xf32>
    %16 = arith.addf %14, %15 : vector<8x32xf32>
    %c0_13 = arith.constant 0 : index
    %c0_14 = arith.constant 0 : index
    %17 = vector.load %arg6[%c0_13, %c0_14] : memref<8x32xf32, #tpu.memory_space<vmem>>, vector<8x32xf32>
    tpu.vector_store %arg6[%c0_13, %c0_14], %16 {strides = array<i32>} : memref<8x32xf32, #tpu.memory_space<vmem>>, vector<8x32xf32>,
    return
  }
  func.func @transform_0(%arg0: i32) -> (i32, i32) {
    %c0_i32 = arith.constant 0 : i32
    %c0_i32_0 = arith.constant 0 : i32
    return %arg0, %c0_i32 : i32, i32
  }
  func.func @transform_1(%arg0: i32) -> (i32, i32) {
    %c0_i32 = arith.constant 0 : i32
    %c0_i32_0 = arith.constant 0 : i32
    %c0_i32_1 = arith.constant 0 : i32
    return %c0_i32, %c0_i32_0 : i32, i32
  }
  func.func @transform_2(%arg0: i32) -> (i32, i32) {
    %c0_i32 = arith.constant 0 : i32
    %c0_i32_0 = arith.constant 0 : i32
    %c0_i32_1 = arith.constant 0 : i32
    return %c0_i32, %c0_i32_0 : i32, i32
  }
  func.func @transform_3(%arg0: i32) -> (i32, i32) {
    %c0_i32 = arith.constant 0 : i32
    %c0_i32_0 = arith.constant 0 : i32
    %c0_i32_1 = arith.constant 0 : i32
    return %c0_i32, %c0_i32_0 : i32, i32
  }
  func.func @transform_4(%arg0: i32) -> (i32, i32) {
    %c0_i32 = arith.constant 0 : i32
    %c0_i32_0 = arith.constant 0 : i32
    %c0_i32_1 = arith.constant 0 : i32
    return %c0_i32, %c0_i32_0 : i32, i32
  }
  func.func @transform_5(%arg0: i32) -> (i32, i32) {
    %c0_i32 = arith.constant 0 : i32
    %c0_i32_0 = arith.constant 0 : i32
    return %arg0, %c0_i32 : i32, i32
  }
}

module attributes {stable_mosaic.version = 11 : i64} {
  func.func @adapter_kernel(%arg0: i32, %arg1: memref<8x32xf32, #tpu.memory_space<vmem>>, %arg2: memref<32x16xbf16, #tpu.memory_space<vmem>>, %arg3: memref<1x16xf32, #tpu.memory_space<vmem>>, %arg4: memref<16x32xbf16, #tpu.memory_space<vmem>>, %arg5: memref<1x32xf32, #tpu.memory_space<vmem>>, %arg6: memref<8x32xf32, #tpu.memory_space<vmem>>) attributes {dimension_semantics = [#tpu.dimension_semantics<parallel>], iteration_bounds = array<i64: 2>, scalar_prefetch = 0 : i64, scratch_operands = 0 : i64, tpu.core_type = #tpu.core_type<tc>, window_params = [{transform_indices = @transform_0, window_bounds = array<i64: 8, 32>}, {pipeline_mode = #tpu.pipeline_mode<synchronous>, transform_indices = @transform_1, window_bounds = array<i64: 32, 16>}, {pipeline_mode = #tpu.pipeline_mode<synchronous>, transform_indices = @transform_2, window_bounds = array<i64: 1, 16>}, {pipeline_mode = #tpu.pipeline_mode<synchronous>, transform_indices = @transform_3, window_bounds = array<i64: 16, 32>}, {pipeline_mode = #tpu.pipeline_mode<synchronous>, transform_indices = @transform_4, window_bounds = array<i64: 1, 32>}, {transform_indices = @transform_5, window_bounds = array<i64: 8, 32>}]} {
    %c0 = arith.constant 0 : index
    %c0_0 = arith.constant 0 : index
    %0 = vector.load %arg1[%c0, %c0_0] : memref<8x32xf32, #tpu.memory_space<vmem>>, vector<8x32xf32>
    %1 = arith.truncf %0 : vector<8x32xf32> to vector<8x32xbf16>
    %c0_1 = arith.constant 0 : index
    %c0_2 = arith.constant 0 : index
    %2 = vector.load %arg2[%c0_1, %c0_2] : memref<32x16xbf16, #tpu.memory_space<vmem>>, vector<32x16xbf16>
    %cst = arith.constant dense<0.000000e+00> : vector<8x16xf32>
    %3 = tpu.matmul %1, %2, %cst {dimension_numbers = #tpu.dot_dimension_numbers<[1], [0], [0], [1], [0, 0, 1, 1], [], []>} : vector<8x32xbf16>, vector<32x16xbf16>, vector<8x16xf32> -> vector<8x16xf32>
    %c0_3 = arith.constant 0 : index
    %c0_4 = arith.constant 0 : index
    %4 = vector.load %arg3[%c0_3, %c0_4] : memref<1x16xf32, #tpu.memory_space<vmem>>, vector<1x16xf32>
    %5 = vector.broadcast %4 : vector<1x16xf32> to vector<8x16xf32>
    %6 = arith.addf %3, %5 : vector<8x16xf32>
    %cst_5 = arith.constant 0.000000e+00 : f32
    %7 = vector.broadcast %cst_5 : f32 to vector<8x16xf32>
    %8 = arith.maximumf %6, %7 : vector<8x16xf32>
    %9 = arith.truncf %8 : vector<8x16xf32> to vector<8x16xbf16>
    %c0_6 = arith.constant 0 : index
    %c0_7 = arith.constant 0 : index
    %10 = vector.load %arg4[%c0_6, %c0_7] : memref<16x32xbf16, #tpu.memory_space<vmem>>, vector<16x32xbf16>
    %cst_8 = arith.constant dense<0.000000e+00> : vector<8x32xf32>
    %11 = tpu.matmul %9, %10, %cst_8 {dimension_numbers = #tpu.dot_dimension_numbers<[1], [0], [0], [1], [0, 0, 1, 1], [], []>} : vector<8x16xbf16>, vector<16x32xbf16>, vector<8x32xf32> -> vector<8x32xf32>
    %c0_9 = arith.constant 0 : index
    %c0_10 = arith.constant 0 : index
    %12 = vector.load %arg5[%c0_9, %c0_10] : memref<1x32xf32, #tpu.memory_space<vmem>>, vector<1x32xf32>
    %13 = vector.broadcast %12 : vector<1x32xf32> to vector<8x32xf32>
    %14 = arith.addf %11, %13 : vector<8x32xf32>
    %c0_11 = arith.constant 0 : index
    %c0_12 = arith.constant 0 : index
    %15 = vector.load %arg1[%c0_11, %c0_12] : memref<8x32xf32, #tpu.memory_space<vmem>>, vector<8x32xf32>
    %16 = arith.addf %14, %15 : vector<8x32xf32>
    %c0_13 = arith.constant 0 : index
    %c0_14 = arith.constant 0 : index
    %17 = vector.load %arg6[%c0_13, %c0_14] : memref<8x32xf32, #tpu.memory_space<vmem>>, vector<8x32xf32>
    tpu.vector_store %arg6[%c0_13, %c0_14], %16 {strides = array<i32>} : memref<8x32xf32, #tpu.memory_space<vmem>>, vector<8x32xf32>,
    return
  }
  func.func @transform_0(%arg0: i32) -> (i32, i32) {
    %c0_i32 = arith.constant 0 : i32
    %c0_i32_0 = arith.constant 0 : i32
    return %arg0, %c0_i32 : i32, i32
  }
  func.func @transform_1(%arg0: i32) -> (i32, i32) {
    %c0_i32 = arith.constant 0 : i32
    %c0_i32_0 = arith.constant 0 : i32
    %c0_i32_1 = arith.constant 0 : i32
    return %c0_i32, %c0_i32_0 : i32, i32
  }
  func.func @transform_2(%arg0: i32) -> (i32, i32) {
    %c0_i32 = arith.constant 0 : i32
    %c0_i32_0 = arith.constant 0 : i32
    %c0_i32_1 = arith.constant 0 : i32
    return %c0_i32, %c0_i32_0 : i32, i32
  }
  func.func @transform_3(%arg0: i32) -> (i32, i32) {
    %c0_i32 = arith.constant 0 : i32
    %c0_i32_0 = arith.constant 0 : i32
    %c0_i32_1 = arith.constant 0 : i32
    return %c0_i32, %c0_i32_0 : i32, i32
  }
  func.func @transform_4(%arg0: i32) -> (i32, i32) {
    %c0_i32 = arith.constant 0 : i32
    %c0_i32_0 = arith.constant 0 : i32
    %c0_i32_1 = arith.constant 0 : i32
    return %c0_i32, %c0_i32_0 : i32, i32
  }
  func.func @transform_5(%arg0: i32) -> (i32, i32) {
    %c0_i32 = arith.constant 0 : i32
    %c0_i32_0 = arith.constant 0 : i32
    return %arg0, %c0_i32 : i32, i32
  }
}

</mosaic_0001>

<bundles_post_ra>
// kernel: adapter_layer.1
= control target key start
LH: loop header
LB: loop body
LE: loop exit
PB: predicated region body
PF: predicated region fallthrough
CT: control target
= control target key end

     0   :  { %10 = vsyncpa [#allocation3], 0  ;;  %s720_s0 = inlined_call_operand.vmem [shape: f32[16,32], index: 0, kind: input, shape index: {}]   ;;  %s721_s1 = inlined_call_operand.vmem [shape: bf16[32,16], index: 1, kind: input, shape index: {}]   ;;  %s722_s2 = inlined_call_operand.vmem [shape: f32[1,16], index: 2, kind: input, shape index: {}]   ;;  %s723_s3 = inlined_call_operand.vmem [shape: bf16[16,32], index: 3, kind: input, shape index: {}]   ;;  %s724_s4 = inlined_call_operand.vmem [shape: f32[1,32], index: 4, kind: input, shape index: {}]   ;;  %s725_s5 = inlined_call_operand.hbm [shape: f32[16,32], index: 5, kind: output, shape index: {}]  }
   0x1   :  { %12 = vsyncpa [#allocation3 + $0x1], 0  ;;  %s603_s18 = smov 0   ;;  %s605_s19 = smov 0  }
   0x2   :  { %s607_s20 = smov 0   ;;  %s609_s21 = smov 0  }
   0x3 LB: > { %s624_s22 = sadd.s32 4294967295, %s568_s21   ;;  %s426_s23 = sadd.s32 4294967294, %s568_s21   ;;  %s568_s21 = sphi %s609_s21, %s731_s21   ;;  %s564_s20 = sphi %s607_s20, %s730_s20   ;;  %s560_s19 = sphi %s605_s19, %s729_s19   ;;  %s556_s18 = sphi %s603_s18, %s728_s18  }
   0x4   : > { %s628_s24 = sadd.s32 1, %s568_s21   ;;  %s135_s25 = sadd.s32 1, %s564_s20 }
   0x5   : > { %s132_s26 = ssub.s32 %s568_s21, %s628_s24  ;;  %p145_p0 = scmp.ne.s32.totalorder %s564_s20, %s560_s19 }
   0x6   : > { %p133_p1 = scmp.eq.s32.totalorder %s132_s26, 0  ;;  %p146_p2 = scmp.eq.s32.totalorder %s624_s22, 1 }
   0x7   : > { %p151_p3 = scmp.ne.s32.totalorder %s560_s19, %s556_s18  ;;  %p152_p4 = scmp.eq.s32.totalorder %s426_s23, 1 }
   0x8   : > { %s639_s27 = scalar_select %p133_p1, %s564_s20, %s135_s25  }
   0x9   : > { %p641_p5 = por %p146_p2, %p145_p0  ;;  %p645_p6 = por %p152_p4, %p151_p3 }
   0xa   : > { %p429_p7 = scmp.ge.s32.totalorder %s568_s21, 1  ;;  %p189_p8 = scmp.lt.s32.totalorder %s568_s21, 3 }
   0xc   : > { %p190_p9 = pnand %p429_p7, %p189_p8 }
   0xd   : > { %v503_v0 = vld [vmem:[%s721_s1] sm:$0xff] (!%p190_p9)   ;;  %v570_v1 = vmov (!%p190_p9), 0.0   ;;  %v504_v2 = vld [vmem:[%s721_s1 + $0x8] sm:$0xff] (!%p190_p9)   ;;  %vm571_vm0 = vmmov (!%p190_p9), 0   ;;  %p216_p10 = scmp.lt.s32.totalorder (!%p190_p9), %s624_s22, 1  ;;  %vm246_vm1 = vcmask (!%p190_p9), 261120  }
   0xe   : > { %193 = sbr.rel (%p190_p9) target bundleno = 476 (0x1dc), region = 40  ;;  %448 = vmatprep.subr.bf16.mxu0 (!%p190_p9), %v570_v1  ;;  %456 = vmatprep.subr.bf16.mxu1 (!%p190_p9), %v570_v1  ;;  %v505_v5 = vld [vmem:[%s723_s3] sm:$0xff] (!%p190_p9)   ;;  %vm307_vm2 = vcmask (!%p190_p9), 130048   ;;  %s213_s23 = sand.u32 (!%p190_p9), 1, %s560_s19  }
   0xf   : > { %449 = vmatpush3.bf16.msra.mxu0 (!%p190_p9), %v503_v0  ;;  %452 = vmatprep.mubr.msk.bf16.mxu0 (!%p190_p9), %vm571_vm0, %v570_v1  ;;  %v432_v6 = vld [vmem:[%s722_s2] ss:$0 sm:$0xff] (!%p190_p9)  ;;  %s430_s25 = sshll.u32 (!%p190_p9), %s213_s23, 3  ;;  %s440_s6 = sshll.u32 (!%p190_p9), %s624_s22, 7 }
  0x10   : > { %450 = vmatprep.subr.bf16.mxu0 (!%p190_p9), %v570_v1  ;;  %458 = vmatprep.mubr.msk.bf16.mxu1 (!%p190_p9), %vm571_vm0, %v570_v1  ;;  %v436_v14 = vld [vmem:[%s724_s4] ss:$0 sm:$0xff] (!%p190_p9)  ;;  %s215_s7 = scalar_lea.vmem (!%p190_p9), [#allocation2], %s430_s25  ;;  %s677_s11 = scalar_lea.hbm (!%p190_p9), %s725_s5, %s440_s6 }
  0x11   : > { %457 = vmatpush3.bf16.msra.mxu1 (!%p190_p9), %v505_v5  ;;  %s367_s8 = sshll.u32 (!%p190_p9), %s215_s7, 4  ;;  %s679_s8 = int_to_ptr.vmem [resolvable:$true] %s367_s8 }
  0x12   : > { %s506_s12 = scalar_lea.vmem (!%p190_p9), %s679_s8, 128 }
  0x13   : > { %451 = vmatpush3.bf16.msra.mxu0 (!%p190_p9), %v504_v2  ;;  %p507_p11 = scmp.ne.s32.totalorder (!%p190_p9), %s679_s8, %s506_s12 }
  0x15   : > { %s217_s9 = scalar_select %p216_p10, %s624_s22, 1 }
  0x16   : > { %s354_s22 = scalar_lea.sflag [#allocation3], %s213_s23  ;;  %p508_p12 = pnand %p507_p11, %p641_p5 }
  0x17   : > { %s431_s10 = sshll.u32 %s217_s9, 3 }
  0x18   : > { %s219_s13 = scalar_lea.vmem %s720_s0, %s431_s10  ;;  %p509_p13 = pneg %p508_p12 }
  0x19   : > { %v221_v3 = vld [vmem:[%s219_s13] sm:$0xff]  ;;  %s572_s13 = smov [#allocation2]  }
  0x1a   : > { %v222_v4 = vpack.c.bf16 %v221_v3, %v221_v3  ;;  %s510_s14 = sshll.u32 %s572_s13, 4  ;;  %s511_s14 = int_to_ptr.vmem [resolvable:$false] %s510_s14 }
  0x1b   : > { %s512_s15 = scalar_lea.vmem %s511_s14, 256  ;;  %p513_p0 = scmp.lt.s32.totalorder %s679_s8, %s511_s14 }
  0x1c   : > { %453 = vmatmul.mubr.msk.bf16.vlgmr.msra.gmra.mrb[0].mxu0 %vm246_vm1, %v222_v4  ;;  %p514_p1 = scmp.lt.s32.totalorder %s512_s15, %s506_s12 }
  0x1e   : > { %p515_p2 = por %p514_p1, %p513_p0 }
  0x20   : > { %p516_p3 = pnand %p515_p2, %p509_p13 }
  0xef   : > { %v284_v7 = vpop.f32.mrb[0].mxu0 }
  0xf0   : > { %v285_v8 = vadd.f32 %v432_v6, %v284_v7  ;;  %v454_v9 = vpop.f32.mrb[1].mxu0 }
  0xf1   : > { %v287_v10 = vpop.f32.mrb[2].mxu0 }
  0xf2   : > { %v290_v11 = vmax.f32 %v285_v8, 0.0  ;;  %v455_v12 = vpop.f32.mrb[3].mxu0 }
  0xf4   : > { %v291_v13 = vpack.c.bf16 %v290_v11, %v290_v11 }
  0xf6   : > { %459 = vmatmul.mubr.msk.bf16.vlgmr.msra.gmra.mrb[0].mxu1 %vm307_vm2, %v291_v13 }
 0x1c9   : > { %v345_v15 = vpop.f32.mrb[0].mxu1 }
 0x1ca   : > { %v346_v16 = vadd.f32 %v436_v14, %v345_v15  ;;  %v460_v17 = vpop.f32.mrb[1].mxu1 }
 0x1cb   : > { %v348_v18 = vpop.f32.mrb[2].mxu1 }
 0x1cc   : > { %v351_v19 = vadd.f32 %v346_v16, %v221_v3  ;;  %v461_v20 = vpop.f32.mrb[3].mxu1 }
 0x1ce   : > { %352 = vst.msk [vmem:[%s215_s7] sm:$0xff] %vm246_vm1, %v351_v19 }
 0x1cf   : > { %519 = shalt.err (!%p516_p3)
}
 0x1d0   : > { %s520_s16 = scalar_lea.hbm %s677_s11, 128  ;;  %s524_s25 = scalar_lea.hbm %s725_s5, 256 }
 0x1d1   : > { %p521_p4 = scmp.ne.s32.totalorder %s677_s11, %s520_s16  ;;  %p525_p9 = scmp.lt.u32.totalorder %s677_s11, %s725_s5 }
 0x1d2   : > { %p526_p10 = scmp.lt.u32.totalorder %s524_s25, %s520_s16  ;;  %p528_p12 = scmp.lt.u32.totalorder %s520_s16, %s677_s11 }
 0x1d3   : > { %p522_p7 = pnand %p521_p4, %p641_p5 }
 0x1d4   : > { %p527_p11 = por %p526_p10, %p525_p9 }
 0x1d5   : > { %p523_p8 = pneg %p522_p7 }
 0x1d6   : > { %p529_p13 = por %p528_p12, %p527_p11 }
 0x1d8   : > { %p530_p0 = pnand %p529_p13, %p523_p8 }
 0x1da   : > { %533 = shalt.err (!%p530_p0)
}
 0x1db   : > { %462 = dma.vmem_to_hbm [thread:$0]  (%p641_p5), %s679_s8, 128, %s677_s11, %s354_s22  }
 0x1dc PF: > { %p468_p1 = scmp.ge.s32.totalorder %s568_s21, 2  ;;  %s379_s6 = sand.u32 1, %s556_s18  }
 0x1dd   : > { %s380_s7 = scalar_lea.sflag [#allocation3], %s379_s6 }
 0x1de   : > { %p465_p2 = pnand %p468_p1, %p645_p6 }
 0x1e0   : > { %551 = dma.done.wait (!%p465_p2), %s380_s7, 128  }
 0x1e1   : > { %553 = vsyncadd (!%p465_p2), %s380_s7, 4294967168  ;;  %p15_p3 = scmp.ge.s32.totalorder %s628_s24, 4   ;;  %s728_s18 = smov %s560_s19 }
 0x1e2   : > { %s729_s19 = smov %s564_s20  ;;  %s730_s20 = smov %s639_s27 }
 0x1e3   : > { %s731_s21 = smov %s628_s24  ;;  %17 = sbr.rel (!%p15_p3) target bundleno = 3 (0x3), region = 75 }
 0x1ea   :  { %385 = vsyncpa [#allocation3], 1 }
 0x1eb   :  { %387 = vsyncpa [#allocation3 + $0x1], 1 }

// kernel: _lambda_.1
= control target key start
LH: loop header
LB: loop body
LE: loop exit
PB: predicated region body
PF: predicated region fallthrough
CT: control target
= control target key end

     0   :  { %10 = vsyncpa [#allocation3], 0  ;;  %s720_s0 = inlined_call_operand.vmem [shape: f32[16,32], index: 0, kind: input, shape index: {}]   ;;  %s721_s1 = inlined_call_operand.vmem [shape: bf16[32,16], index: 1, kind: input, shape index: {}]   ;;  %s722_s2 = inlined_call_operand.vmem [shape: f32[1,16], index: 2, kind: input, shape index: {}]   ;;  %s723_s3 = inlined_call_operand.vmem [shape: bf16[16,32], index: 3, kind: input, shape index: {}]   ;;  %s724_s4 = inlined_call_operand.vmem [shape: f32[1,32], index: 4, kind: input, shape index: {}]   ;;  %s725_s5 = inlined_call_operand.hbm [shape: f32[16,32], index: 5, kind: output, shape index: {}]  }
   0x1   :  { %12 = vsyncpa [#allocation3 + $0x1], 0  ;;  %s603_s18 = smov 0   ;;  %s605_s19 = smov 0  }
   0x2   :  { %s607_s20 = smov 0   ;;  %s609_s21 = smov 0  }
   0x3 LB: > { %s624_s22 = sadd.s32 4294967295, %s568_s21   ;;  %s426_s23 = sadd.s32 4294967294, %s568_s21   ;;  %s568_s21 = sphi %s609_s21, %s731_s21   ;;  %s564_s20 = sphi %s607_s20, %s730_s20   ;;  %s560_s19 = sphi %s605_s19, %s729_s19   ;;  %s556_s18 = sphi %s603_s18, %s728_s18  }
   0x4   : > { %s628_s24 = sadd.s32 1, %s568_s21   ;;  %s135_s25 = sadd.s32 1, %s564_s20 }
   0x5   : > { %s132_s26 = ssub.s32 %s568_s21, %s628_s24  ;;  %p145_p0 = scmp.ne.s32.totalorder %s564_s20, %s560_s19 }
   0x6   : > { %p133_p1 = scmp.eq.s32.totalorder %s132_s26, 0  ;;  %p146_p2 = scmp.eq.s32.totalorder %s624_s22, 1 }
   0x7   : > { %p151_p3 = scmp.ne.s32.totalorder %s560_s19, %s556_s18  ;;  %p152_p4 = scmp.eq.s32.totalorder %s426_s23, 1 }
   0x8   : > { %s639_s27 = scalar_select %p133_p1, %s564_s20, %s135_s25  }
   0x9   : > { %p641_p5 = por %p146_p2, %p145_p0  ;;  %p645_p6 = por %p152_p4, %p151_p3 }
   0xa   : > { %p429_p7 = scmp.ge.s32.totalorder %s568_s21, 1  ;;  %p189_p8 = scmp.lt.s32.totalorder %s568_s21, 3 }
   0xc   : > { %p190_p9 = pnand %p429_p7, %p189_p8 }
   0xd   : > { %v503_v0 = vld [vmem:[%s721_s1] sm:$0xff] (!%p190_p9)   ;;  %v570_v1 = vmov (!%p190_p9), 0.0   ;;  %v504_v2 = vld [vmem:[%s721_s1 + $0x8] sm:$0xff] (!%p190_p9)   ;;  %vm571_vm0 = vmmov (!%p190_p9), 0   ;;  %p216_p10 = scmp.lt.s32.totalorder (!%p190_p9), %s624_s22, 1  ;;  %vm246_vm1 = vcmask (!%p190_p9), 261120  }
   0xe   : > { %193 = sbr.rel (%p190_p9) target bundleno = 476 (0x1dc), region = 40  ;;  %448 = vmatprep.subr.bf16.mxu0 (!%p190_p9), %v570_v1  ;;  %456 = vmatprep.subr.bf16.mxu1 (!%p190_p9), %v570_v1  ;;  %v505_v5 = vld [vmem:[%s723_s3] sm:$0xff] (!%p190_p9)   ;;  %vm307_vm2 = vcmask (!%p190_p9), 130048   ;;  %s213_s23 = sand.u32 (!%p190_p9), 1, %s560_s19  }
   0xf   : > { %449 = vmatpush3.bf16.msra.mxu0 (!%p190_p9), %v503_v0  ;;  %452 = vmatprep.mubr.msk.bf16.mxu0 (!%p190_p9), %vm571_vm0, %v570_v1  ;;  %v432_v6 = vld [vmem:[%s722_s2] ss:$0 sm:$0xff] (!%p190_p9)  ;;  %s430_s25 = sshll.u32 (!%p190_p9), %s213_s23, 3  ;;  %s440_s6 = sshll.u32 (!%p190_p9), %s624_s22, 7 }
  0x10   : > { %450 = vmatprep.subr.bf16.mxu0 (!%p190_p9), %v570_v1  ;;  %458 = vmatprep.mubr.msk.bf16.mxu1 (!%p190_p9), %vm571_vm0, %v570_v1  ;;  %v436_v14 = vld [vmem:[%s724_s4] ss:$0 sm:$0xff] (!%p190_p9)  ;;  %s215_s7 = scalar_lea.vmem (!%p190_p9), [#allocation2], %s430_s25  ;;  %s677_s11 = scalar_lea.hbm (!%p190_p9), %s725_s5, %s440_s6 }
  0x11   : > { %457 = vmatpush3.bf16.msra.mxu1 (!%p190_p9), %v505_v5  ;;  %s367_s8 = sshll.u32 (!%p190_p9), %s215_s7, 4  ;;  %s679_s8 = int_to_ptr.vmem [resolvable:$true] %s367_s8 }
  0x12   : > { %s506_s12 = scalar_lea.vmem (!%p190_p9), %s679_s8, 128 }
  0x13   : > { %451 = vmatpush3.bf16.msra.mxu0 (!%p190_p9), %v504_v2  ;;  %p507_p11 = scmp.ne.s32.totalorder (!%p190_p9), %s679_s8, %s506_s12 }
  0x15   : > { %s217_s9 = scalar_select %p216_p10, %s624_s22, 1 }
  0x16   : > { %s354_s22 = scalar_lea.sflag [#allocation3], %s213_s23  ;;  %p508_p12 = pnand %p507_p11, %p641_p5 }
  0x17   : > { %s431_s10 = sshll.u32 %s217_s9, 3 }
  0x18   : > { %s219_s13 = scalar_lea.vmem %s720_s0, %s431_s10  ;;  %p509_p13 = pneg %p508_p12 }
  0x19   : > { %v221_v3 = vld [vmem:[%s219_s13] sm:$0xff]  ;;  %s572_s13 = smov [#allocation2]  }
  0x1a   : > { %v222_v4 = vpack.c.bf16 %v221_v3, %v221_v3  ;;  %s510_s14 = sshll.u32 %s572_s13, 4  ;;  %s511_s14 = int_to_ptr.vmem [resolvable:$false] %s510_s14 }
  0x1b   : > { %s512_s15 = scalar_lea.vmem %s511_s14, 256  ;;  %p513_p0 = scmp.lt.s32.totalorder %s679_s8, %s511_s14 }
  0x1c   : > { %453 = vmatmul.mubr.msk.bf16.vlgmr.msra.gmra.mrb[0].mxu0 %vm246_vm1, %v222_v4  ;;  %p514_p1 = scmp.lt.s32.totalorder %s512_s15, %s506_s12 }
  0x1e   : > { %p515_p2 = por %p514_p1, %p513_p0 }
  0x20   : > { %p516_p3 = pnand %p515_p2, %p509_p13 }
  0xef   : > { %v284_v7 = vpop.f32.mrb[0].mxu0 }
  0xf0   : > { %v285_v8 = vadd.f32 %v432_v6, %v284_v7  ;;  %v454_v9 = vpop.f32.mrb[1].mxu0 }
  0xf1   : > { %v287_v10 = vpop.f32.mrb[2].mxu0 }
  0xf2   : > { %v290_v11 = vmax.f32 %v285_v8, 0.0  ;;  %v455_v12 = vpop.f32.mrb[3].mxu0 }
  0xf4   : > { %v291_v13 = vpack.c.bf16 %v290_v11, %v290_v11 }
  0xf6   : > { %459 = vmatmul.mubr.msk.bf16.vlgmr.msra.gmra.mrb[0].mxu1 %vm307_vm2, %v291_v13 }
 0x1c9   : > { %v345_v15 = vpop.f32.mrb[0].mxu1 }
 0x1ca   : > { %v346_v16 = vadd.f32 %v436_v14, %v345_v15  ;;  %v460_v17 = vpop.f32.mrb[1].mxu1 }
 0x1cb   : > { %v348_v18 = vpop.f32.mrb[2].mxu1 }
 0x1cc   : > { %v351_v19 = vadd.f32 %v346_v16, %v221_v3  ;;  %v461_v20 = vpop.f32.mrb[3].mxu1 }
 0x1ce   : > { %352 = vst.msk [vmem:[%s215_s7] sm:$0xff] %vm246_vm1, %v351_v19 }
 0x1cf   : > { %519 = shalt.err (!%p516_p3)
}
 0x1d0   : > { %s520_s16 = scalar_lea.hbm %s677_s11, 128  ;;  %s524_s25 = scalar_lea.hbm %s725_s5, 256 }
 0x1d1   : > { %p521_p4 = scmp.ne.s32.totalorder %s677_s11, %s520_s16  ;;  %p525_p9 = scmp.lt.u32.totalorder %s677_s11, %s725_s5 }
 0x1d2   : > { %p526_p10 = scmp.lt.u32.totalorder %s524_s25, %s520_s16  ;;  %p528_p12 = scmp.lt.u32.totalorder %s520_s16, %s677_s11 }
 0x1d3   : > { %p522_p7 = pnand %p521_p4, %p641_p5 }
 0x1d4   : > { %p527_p11 = por %p526_p10, %p525_p9 }
 0x1d5   : > { %p523_p8 = pneg %p522_p7 }
 0x1d6   : > { %p529_p13 = por %p528_p12, %p527_p11 }
 0x1d8   : > { %p530_p0 = pnand %p529_p13, %p523_p8 }
 0x1da   : > { %533 = shalt.err (!%p530_p0)
}
 0x1db   : > { %462 = dma.vmem_to_hbm [thread:$0]  (%p641_p5), %s679_s8, 128, %s677_s11, %s354_s22  }
 0x1dc PF: > { %p468_p1 = scmp.ge.s32.totalorder %s568_s21, 2  ;;  %s379_s6 = sand.u32 1, %s556_s18  }
 0x1dd   : > { %s380_s7 = scalar_lea.sflag [#allocation3], %s379_s6 }
 0x1de   : > { %p465_p2 = pnand %p468_p1, %p645_p6 }
 0x1e0   : > { %551 = dma.done.wait (!%p465_p2), %s380_s7, 128  }
 0x1e1   : > { %553 = vsyncadd (!%p465_p2), %s380_s7, 4294967168  ;;  %p15_p3 = scmp.ge.s32.totalorder %s628_s24, 4   ;;  %s728_s18 = smov %s560_s19 }
 0x1e2   : > { %s729_s19 = smov %s564_s20  ;;  %s730_s20 = smov %s639_s27 }
 0x1e3   : > { %s731_s21 = smov %s628_s24  ;;  %17 = sbr.rel (!%p15_p3) target bundleno = 3 (0x3), region = 75 }
 0x1ea   :  { %385 = vsyncpa [#allocation3], 1 }
 0x1eb   :  { %387 = vsyncpa [#allocation3 + $0x1], 1 }

</bundles_post_ra>
